<compile_context>
chip_gen: v5e
topology: v5e:2x2
jax: 0.10.0
libtpu: 0.0.40
codegen_flags: <defaults>
</compile_context>

<pallas_src>
import functools

import jax
import jax.numpy as jnp
from jax.experimental import pallas as pl
from jax.experimental.pallas import tpu as pltpu


TM_TARGET = 512  # pixels per tile on the lane axis (~85% of HBM roofline regime)


def detect_kernel(x_ref, w_ref, chan_ref, gxy_ref, raw_ref, dec_ref):
    """One grid step: all OC channels x one TM-pixel tile (lane-dense).

    x_ref:    (C, TM)   input pixels (channels on sublanes, pixels on lanes)
    w_ref:    (OC, C)   1x1 conv weight
    chan_ref: (OC, 5)   per-channel constants: [bias, lin, wh_scale, is_x, is_y]
    gxy_ref:  (2, TM)   per-pixel (x-0.5)*stride and (y-0.5)*stride rows
    raw_ref:  (OC, TM)  raw conv output (conv/NCHW layout, the "x[i]" tensor)
    dec_ref:  (OC, TM)  decoded predictions
    """
    acc = jnp.dot(w_ref[...], x_ref[...], preferred_element_type=jnp.float32)
    acc = acc + chan_ref[:, 0:1]                      # + bias (OC,1) broadcast
    raw_ref[...] = acc

    # sigmoid: exp on the EUP; reciprocal kept exact (approx=True would need
    # re-verifying the 1e-3/1e-4 tolerance on the large wh channels).
    s = pl.reciprocal(1.0 + jnp.exp(-acc), approx=False)

    # decode: s*lin + s^2*wh_scale + is_x*gx + is_y*gy
    #   xy channels: lin = 2*stride          -> (2*s + (g - 0.5)) * stride
    #   wh channels: wh_scale = 4*a*stride   -> (2*s)^2 * anchor * stride
    #   conf/cls:    lin = 1                 -> s
    dec_ref[...] = (s * chan_ref[:, 1:2]
                    + (s * s) * chan_ref[:, 2:3]
                    + chan_ref[:, 3:4] * gxy_ref[0:1, :]
                    + chan_ref[:, 4:5] * gxy_ref[1:2, :])


def _vmem_limit_bytes(C, OC, TM):
    # double-buffered x tile + two double-buffered f32 output tiles + constants
    need = 4 * (2 * C * TM + OC * C + OC * 8 + 2 * 2 * TM + 2 * 2 * OC * TM)
    # 2x headroom, clamped so the same choice stays safe on v7x (64 MiB VMEM).
    return int(min(max(2 * need, 4 << 20), 48 << 20))


def run_level(x_nchw, w, b, stride, anchors_l, na, no):
    """One detection level. Returns (raw (bs,na,ny,nx,no), z (bs,na*ny*nx,no))."""
    bs, C, ny, nx = x_nchw.shape
    OC = na * no
    P = ny * nx
    stride = float(stride)

    # ---- tile size / padding: lane axis = pixels, multiple of 128 (or full) ----
    if P <= TM_TARGET:
        TM, P_pad = P, P
    else:
        TM = TM_TARGET
        P_pad = -(-P // TM) * TM

    # (bs, C, ny, nx) -> (bs, C, P): free reshape, no input transpose needed.
    x_flat = x_nchw.reshape(bs, C, P)
    if P_pad != P:
        x_flat = jnp.pad(x_flat, ((0, 0), (0, 0), (0, P_pad - P)))

    # ---- host-precomputed per-channel constants (hoisted out of the kernel) ----
    c_idx = jnp.arange(OC)
    o_idx = c_idx % no          # output slot within an anchor
    a_idx = c_idx // no         # anchor index
    is_x = (o_idx == 0).astype(jnp.float32)
    is_y = (o_idx == 1).astype(jnp.float32)
    is_w = (o_idx == 2).astype(jnp.float32)
    is_h = (o_idx == 3).astype(jnp.float32)
    is_conf = (o_idx >= 4).astype(jnp.float32)
    aw = anchors_l[a_idx, 0] * stride
    ah = anchors_l[a_idx, 1] * stride
    lin = (is_x + is_y) * (2.0 * stride) + is_conf
    whs = 4.0 * (is_w * aw + is_h * ah)
    chan = jnp.stack([b, lin, whs, is_x, is_y], axis=1)          # (OC, 5)

    # ---- per-pixel grid offsets, pre-scaled by stride, lane-dense (2, P) ----
    gx = (jnp.arange(nx, dtype=jnp.float32) - 0.5) * stride
    gy = (jnp.arange(ny, dtype=jnp.float32) - 0.5) * stride
    gxy = jnp.stack([jnp.tile(gx, ny), jnp.repeat(gy, nx)], axis=0)  # (2, P)
    if P_pad != P:
        gxy = jnp.pad(gxy, ((0, 0), (0, P_pad - P)))

    n_tiles = P_pad // TM

    raw, dec = pl.pallas_call(
        detect_kernel,
        out_shape=(jax.ShapeDtypeStruct((bs, OC, P_pad), jnp.float32),
                   jax.ShapeDtypeStruct((bs, OC, P_pad), jnp.float32)),
        grid_spec=pltpu.PrefetchScalarGridSpec(
            num_scalar_prefetch=0,
            grid=(bs, n_tiles),
            in_specs=[
                pl.BlockSpec((None, C, TM), lambda bi, j: (bi, 0, j)),
                pl.BlockSpec((OC, C), lambda bi, j: (0, 0)),
                pl.BlockSpec((OC, 5), lambda bi, j: (0, 0)),
                pl.BlockSpec((2, TM), lambda bi, j: (0, j)),
            ],
            out_specs=[
                pl.BlockSpec((None, OC, TM), lambda bi, j: (bi, 0, j)),
                pl.BlockSpec((None, OC, TM), lambda bi, j: (bi, 0, j)),
            ],
        ),
        compiler_params=pltpu.CompilerParams(
            dimension_semantics=("parallel", "parallel"),
            vmem_limit_bytes=_vmem_limit_bytes(C, OC, TM),
        ),
    )(x_flat, w, chan, gxy)

    # Same layout permutes PyTorch performs (view + permute(0,1,3,4,2) + view).
    raw5 = raw[:, :, :P].reshape(bs, na, no, ny, nx).transpose(0, 1, 3, 4, 2)
    z = (dec[:, :, :P].reshape(bs, na, no, P)
         .transpose(0, 1, 3, 2).reshape(bs, na * P, no))
    return raw5, z


@functools.partial(jax.jit, static_argnames=("strides", "na", "no"))
def detect_forward(xs, weights, biases, anchors, *, strides, na, no):
    """Eval / non-export path of Detect.forward: returns (cat(z, 1), [x_i...])."""
    raws, zs = [], []
    for i, x in enumerate(xs):
        r, z = run_level(x, weights[i], biases[i], strides[i], anchors[i], na, no)
        raws.append(r)
        zs.append(z)
    return jnp.concatenate(zs, axis=1), raws


# ---------------- pure-JAX reference for verification ----------------
def ref_level(x_nchw, w, b, stride, anchors_l, na, no):
    bs, C, ny, nx = x_nchw.shape
    conv = jnp.einsum("bchw,oc->bohw", x_nchw, w) + b[None, :, None, None]
    xr = conv.reshape(bs, na, no, ny, nx).transpose(0, 1, 3, 4, 2)
    s = jax.nn.sigmoid(xr)
    yv, xv = jnp.meshgrid(jnp.arange(ny, dtype=jnp.float32),
                          jnp.arange(nx, dtype=jnp.float32), indexing="ij")
    grid = jnp.stack([xv, yv], 2)[None, None] - 0.5
    ag = (anchors_l * stride).reshape(1, na, 1, 1, 2)
    xy = (s[..., 0:2] * 2 + grid) * stride
    wh = (s[..., 2:4] * 2) ** 2 * ag
    conf = s[..., 4:]
    y = jnp.concatenate([xy, wh, conf], -1)
    return xr, y.reshape(bs, na * ny * nx, no)


if __name__ == "__main__":
    # Detect(nc=3, anchors with nl=2 levels, na=3 anchors each)
    nc = 3
    no = nc + 5                       # 8
    anchors = jnp.array([[10., 13., 16., 30., 33., 23.],
                         [30., 61., 62., 45., 59., 119.]], jnp.float32)
    nl = anchors.shape[0]
    na = anchors.shape[1] // 2        # 3
    anchors = anchors.reshape(nl, na, 2)
    strides = (8.0, 16.0)
    ch = (8, 16)                      # input channels per level
    bs = 2
    spatial = [(16, 16), (8, 8)]

    key = jax.random.PRNGKey(0)
    keys = jax.random.split(key, 3 * nl)

    # deterministic parameter init (1x1 conv per level), stored as (na*no, C)
    weights, biases = [], []
    for i in range(nl):
        w = jax.random.normal(keys[2 * i], (na * no, ch[i]), jnp.float32) * 0.1
        b = jax.random.normal(keys[2 * i + 1], (na * no,), jnp.float32) * 0.1
        weights.append(w)
        biases.append(b)

    # inputs (PyTorch NCHW)
    xs = []
    for i in range(nl):
        ny, nx = spatial[i]
        xs.append(jax.random.normal(keys[2 * nl + i], (bs, ch[i], ny, nx), jnp.float32))

    z, raw_list = detect_forward(tuple(xs), tuple(weights), tuple(biases), anchors,
                                 strides=strides, na=na, no=no)
    z = jax.block_until_ready(z)
    raw_list = [jax.block_until_ready(r) for r in raw_list]

    # verify against pure-JAX reference
    ref_zs = []
    for i in range(nl):
        r_ref, z_ref = ref_level(xs[i], weights[i], biases[i], strides[i],
                                 anchors[i], na, no)
        ref_zs.append(z_ref)
        assert jnp.allclose(raw_list[i], r_ref, atol=1e-4, rtol=1e-4)
    z_ref_all = jnp.concatenate(ref_zs, axis=1)
    assert jnp.allclose(z, z_ref_all, atol=1e-3, rtol=1e-4)

    # shape sanity: (bs, sum(na*ny*nx), no)
    assert z.shape == (bs, na * (16 * 16 + 8 * 8), no)
    assert raw_list[0].shape == (bs, na, 16, 16, no)
    assert raw_list[1].shape == (bs, na, 8, 8, no)

    print("KERNEL_OK")
</pallas_src>

<mosaic_0001>
module attributes {stable_mosaic.version = 11 : i64} {
  func.func @detect_kernel(%arg0: i32, %arg1: i32, %arg2: memref<1x8x256xf32, #tpu.memory_space<vmem>>, %arg3: memref<24x8xf32, #tpu.memory_space<vmem>>, %arg4: memref<24x5xf32, #tpu.memory_space<vmem>>, %arg5: memref<2x256xf32, #tpu.memory_space<vmem>>, %arg6: memref<1x24x256xf32, #tpu.memory_space<vmem>>, %arg7: memref<1x24x256xf32, #tpu.memory_space<vmem>>) attributes {dimension_semantics = [#tpu.dimension_semantics<parallel>, #tpu.dimension_semantics<parallel>], iteration_bounds = array<i64: 2, 1>, scalar_prefetch = 0 : i64, scratch_operands = 0 : i64, tpu.core_type = #tpu.core_type<tc>, window_params = [{transform_indices = @transform_0, window_bounds = array<i64: 1, 8, 256>}, {pipeline_mode = #tpu.pipeline_mode<synchronous>, transform_indices = @transform_1, window_bounds = array<i64: 24, 8>}, {pipeline_mode = #tpu.pipeline_mode<synchronous>, transform_indices = @transform_2, window_bounds = array<i64: 24, 5>}, {transform_indices = @transform_3, window_bounds = array<i64: 2, 256>}, {transform_indices = @transform_4, window_bounds = array<i64: 1, 24, 256>}, {transform_indices = @transform_5, window_bounds = array<i64: 1, 24, 256>}]} {
    %c0 = arith.constant 0 : index
    %c0_0 = arith.constant 0 : index
    %0 = vector.load %arg3[%c0, %c0_0] : memref<24x8xf32, #tpu.memory_space<vmem>>, vector<24x8xf32>
    %c0_1 = arith.constant 0 : index
    %c0_2 = arith.constant 0 : index
    %c0_3 = arith.constant 0 : index
    %1 = vector.load %arg2[%c0_1, %c0_2, %c0_3] : memref<1x8x256xf32, #tpu.memory_space<vmem>>, vector<1x8x256xf32>
    %2 = vector.shape_cast %1 : vector<1x8x256xf32> to vector<8x256xf32>
    %cst = arith.constant dense<0.000000e+00> : vector<24x256xf32>
    %3 = tpu.matmul %0, %2, %cst {dimension_numbers = #tpu.dot_dimension_numbers<[1], [0], [0], [1], [0, 0, 1, 1], [], []>} : vector<24x8xf32>, vector<8x256xf32>, vector<24x256xf32> -> vector<24x256xf32>
    %c0_4 = arith.constant 0 : index
    %c0_5 = arith.constant 0 : index
    %4 = vector.load %arg4[%c0_4, %c0_5] : memref<24x5xf32, #tpu.memory_space<vmem>>, vector<24x1xf32>
    %5 = vector.broadcast %4 : vector<24x1xf32> to vector<24x256xf32>
    %6 = arith.addf %3, %5 : vector<24x256xf32>
    %c0_6 = arith.constant 0 : index
    %c0_7 = arith.constant 0 : index
    %c0_8 = arith.constant 0 : index
    %7 = vector.load %arg6[%c0_6, %c0_7, %c0_8] : memref<1x24x256xf32, #tpu.memory_space<vmem>>, vector<1x24x256xf32>
    %8 = vector.shape_cast %7 : vector<1x24x256xf32> to vector<24x256xf32>
    %9 = vector.shape_cast %6 : vector<24x256xf32> to vector<1x24x256xf32>
    tpu.vector_store %arg6[%c0_6, %c0_7, %c0_8], %9 {strides = array<i32>} : memref<1x24x256xf32, #tpu.memory_space<vmem>>, vector<1x24x256xf32>,
    %cst_9 = arith.constant 0.000000e+00 : f32
    %10 = vector.broadcast %cst_9 : f32 to vector<24x256xf32>
    %11 = arith.subf %10, %6 : vector<24x256xf32>
    %12 = math.exp %11 : vector<24x256xf32>
    %cst_10 = arith.constant 1.000000e+00 : f32
    %13 = vector.broadcast %cst_10 : f32 to vector<24x256xf32>
    %14 = arith.addf %13, %12 : vector<24x256xf32>
    %15 = tpu.reciprocal %14 : vector<24x256xf32> -> vector<24x256xf32>
    %c0_11 = arith.constant 0 : index
    %c1 = arith.constant 1 : index
    %16 = vector.load %arg4[%c0_11, %c1] : memref<24x5xf32, #tpu.memory_space<vmem>>, vector<24x1xf32>
    %17 = vector.broadcast %16 : vector<24x1xf32> to vector<24x256xf32>
    %18 = arith.mulf %15, %17 : vector<24x256xf32>
    %19 = arith.mulf %15, %15 : vector<24x256xf32>
    %c0_12 = arith.constant 0 : index
    %c2 = arith.constant 2 : index
    %20 = vector.load %arg4[%c0_12, %c2] : memref<24x5xf32, #tpu.memory_space<vmem>>, vector<24x1xf32>
    %21 = vector.broadcast %20 : vector<24x1xf32> to vector<24x256xf32>
    %22 = arith.mulf %19, %21 : vector<24x256xf32>
    %23 = arith.addf %18, %22 : vector<24x256xf32>
    %c0_13 = arith.constant 0 : index
    %c3 = arith.constant 3 : index
    %24 = vector.load %arg4[%c0_13, %c3] : memref<24x5xf32, #tpu.memory_space<vmem>>, vector<24x1xf32>
    %c0_14 = arith.constant 0 : index
    %c0_15 = arith.constant 0 : index
    %25 = vector.load %arg5[%c0_14, %c0_15] : memref<2x256xf32, #tpu.memory_space<vmem>>, vector<1x256xf32>
    %26 = vector.broadcast %24 : vector<24x1xf32> to vector<24x256xf32>
    %27 = vector.broadcast %25 : vector<1x256xf32> to vector<24x256xf32>
    %28 = arith.mulf %26, %27 : vector<24x256xf32>
    %29 = arith.addf %23, %28 : vector<24x256xf32>
    %c0_16 = arith.constant 0 : index
    %c4 = arith.constant 4 : index
    %30 = vector.load %arg4[%c0_16, %c4] : memref<24x5xf32, #tpu.memory_space<vmem>>, vector<24x1xf32>
    %c1_17 = arith.constant 1 : index
    %c0_18 = arith.constant 0 : index
    %31 = vector.load %arg5[%c1_17, %c0_18] : memref<2x256xf32, #tpu.memory_space<vmem>>, vector<1x256xf32>
    %32 = vector.broadcast %30 : vector<24x1xf32> to vector<24x256xf32>
    %33 = vector.broadcast %31 : vector<1x256xf32> to vector<24x256xf32>
    %34 = arith.mulf %32, %33 : vector<24x256xf32>
    %35 = arith.addf %29, %34 : vector<24x256xf32>
    %c0_19 = arith.constant 0 : index
    %c0_20 = arith.constant 0 : index
    %c0_21 = arith.constant 0 : index
    %36 = vector.load %arg7[%c0_19, %c0_20, %c0_21] : memref<1x24x256xf32, #tpu.memory_space<vmem>>, vector<1x24x256xf32>
    %37 = vector.shape_cast %36 : vector<1x24x256xf32> to vector<24x256xf32>
    %38 = vector.shape_cast %35 : vector<24x256xf32> to vector<1x24x256xf32>
    tpu.vector_store %arg7[%c0_19, %c0_20, %c0_21], %38 {strides = array<i32>} : memref<1x24x256xf32, #tpu.memory_space<vmem>>, vector<1x24x256xf32>,
    return
  }
  func.func @transform_0(%arg0: i32, %arg1: i32) -> (i32, i32, i32) {
    %c0_i32 = arith.constant 0 : i32
    %c0_i32_0 = arith.constant 0 : i32
    return %arg0, %c0_i32, %arg1 : i32, i32, i32
  }
  func.func @transform_1(%arg0: i32, %arg1: i32) -> (i32, i32) {
    %c0_i32 = arith.constant 0 : i32
    %c0_i32_0 = arith.constant 0 : i32
    %c0_i32_1 = arith.constant 0 : i32
    return %c0_i32, %c0_i32_0 : i32, i32
  }
  func.func @transform_2(%arg0: i32, %arg1: i32) -> (i32, i32) {
    %c0_i32 = arith.constant 0 : i32
    %c0_i32_0 = arith.constant 0 : i32
    %c0_i32_1 = arith.constant 0 : i32
    return %c0_i32, %c0_i32_0 : i32, i32
  }
  func.func @transform_3(%arg0: i32, %arg1: i32) -> (i32, i32) {
    %c0_i32 = arith.constant 0 : i32
    %c0_i32_0 = arith.constant 0 : i32
    return %c0_i32, %arg1 : i32, i32
  }
  func.func @transform_4(%arg0: i32, %arg1: i32) -> (i32, i32, i32) {
    %c0_i32 = arith.constant 0 : i32
    %c0_i32_0 = arith.constant 0 : i32
    return %arg0, %c0_i32, %arg1 : i32, i32, i32
  }
  func.func @transform_5(%arg0: i32, %arg1: i32) -> (i32, i32, i32) {
    %c0_i32 = arith.constant 0 : i32
    %c0_i32_0 = arith.constant 0 : i32
    return %arg0, %c0_i32, %arg1 : i32, i32, i32
  }
}

module attributes {stable_mosaic.version = 11 : i64} {
  func.func @detect_kernel(%arg0: i32, %arg1: i32, %arg2: memref<1x16x64xf32, #tpu.memory_space<vmem>>, %arg3: memref<24x16xf32, #tpu.memory_space<vmem>>, %arg4: memref<24x5xf32, #tpu.memory_space<vmem>>, %arg5: memref<2x64xf32, #tpu.memory_space<vmem>>, %arg6: memref<1x24x64xf32, #tpu.memory_space<vmem>>, %arg7: memref<1x24x64xf32, #tpu.memory_space<vmem>>) attributes {dimension_semantics = [#tpu.dimension_semantics<parallel>, #tpu.dimension_semantics<parallel>], iteration_bounds = array<i64: 2, 1>, scalar_prefetch = 0 : i64, scratch_operands = 0 : i64, tpu.core_type = #tpu.core_type<tc>, window_params = [{transform_indices = @transform_0, window_bounds = array<i64: 1, 16, 64>}, {pipeline_mode = #tpu.pipeline_mode<synchronous>, transform_indices = @transform_1, window_bounds = array<i64: 24, 16>}, {pipeline_mode = #tpu.pipeline_mode<synchronous>, transform_indices = @transform_2, window_bounds = array<i64: 24, 5>}, {transform_indices = @transform_3, window_bounds = array<i64: 2, 64>}, {transform_indices = @transform_4, window_bounds = array<i64: 1, 24, 64>}, {transform_indices = @transform_5, window_bounds = array<i64: 1, 24, 64>}]} {
    %c0 = arith.constant 0 : index
    %c0_0 = arith.constant 0 : index
    %0 = vector.load %arg3[%c0, %c0_0] : memref<24x16xf32, #tpu.memory_space<vmem>>, vector<24x16xf32>
    %c0_1 = arith.constant 0 : index
    %c0_2 = arith.constant 0 : index
    %c0_3 = arith.constant 0 : index
    %1 = vector.load %arg2[%c0_1, %c0_2, %c0_3] : memref<1x16x64xf32, #tpu.memory_space<vmem>>, vector<1x16x64xf32>
    %2 = vector.shape_cast %1 : vector<1x16x64xf32> to vector<16x64xf32>
    %cst = arith.constant dense<0.000000e+00> : vector<24x64xf32>
    %3 = tpu.matmul %0, %2, %cst {dimension_numbers = #tpu.dot_dimension_numbers<[1], [0], [0], [1], [0, 0, 1, 1], [], []>} : vector<24x16xf32>, vector<16x64xf32>, vector<24x64xf32> -> vector<24x64xf32>
    %c0_4 = arith.constant 0 : index
    %c0_5 = arith.constant 0 : index
    %4 = vector.load %arg4[%c0_4, %c0_5] : memref<24x5xf32, #tpu.memory_space<vmem>>, vector<24x1xf32>
    %5 = vector.broadcast %4 : vector<24x1xf32> to vector<24x64xf32>
    %6 = arith.addf %3, %5 : vector<24x64xf32>
    %c0_6 = arith.constant 0 : index
    %c0_7 = arith.constant 0 : index
    %c0_8 = arith.constant 0 : index
    %7 = vector.load %arg6[%c0_6, %c0_7, %c0_8] : memref<1x24x64xf32, #tpu.memory_space<vmem>>, vector<1x24x64xf32>
    %8 = vector.shape_cast %7 : vector<1x24x64xf32> to vector<24x64xf32>
    %9 = vector.shape_cast %6 : vector<24x64xf32> to vector<1x24x64xf32>
    tpu.vector_store %arg6[%c0_6, %c0_7, %c0_8], %9 {strides = array<i32>} : memref<1x24x64xf32, #tpu.memory_space<vmem>>, vector<1x24x64xf32>,
    %cst_9 = arith.constant 0.000000e+00 : f32
    %10 = vector.broadcast %cst_9 : f32 to vector<24x64xf32>
    %11 = arith.subf %10, %6 : vector<24x64xf32>
    %12 = math.exp %11 : vector<24x64xf32>
    %cst_10 = arith.constant 1.000000e+00 : f32
    %13 = vector.broadcast %cst_10 : f32 to vector<24x64xf32>
    %14 = arith.addf %13, %12 : vector<24x64xf32>
    %15 = tpu.reciprocal %14 : vector<24x64xf32> -> vector<24x64xf32>
    %c0_11 = arith.constant 0 : index
    %c1 = arith.constant 1 : index
    %16 = vector.load %arg4[%c0_11, %c1] : memref<24x5xf32, #tpu.memory_space<vmem>>, vector<24x1xf32>
    %17 = vector.broadcast %16 : vector<24x1xf32> to vector<24x64xf32>
    %18 = arith.mulf %15, %17 : vector<24x64xf32>
    %19 = arith.mulf %15, %15 : vector<24x64xf32>
    %c0_12 = arith.constant 0 : index
    %c2 = arith.constant 2 : index
    %20 = vector.load %arg4[%c0_12, %c2] : memref<24x5xf32, #tpu.memory_space<vmem>>, vector<24x1xf32>
    %21 = vector.broadcast %20 : vector<24x1xf32> to vector<24x64xf32>
    %22 = arith.mulf %19, %21 : vector<24x64xf32>
    %23 = arith.addf %18, %22 : vector<24x64xf32>
    %c0_13 = arith.constant 0 : index
    %c3 = arith.constant 3 : index
    %24 = vector.load %arg4[%c0_13, %c3] : memref<24x5xf32, #tpu.memory_space<vmem>>, vector<24x1xf32>
    %c0_14 = arith.constant 0 : index
    %c0_15 = arith.constant 0 : index
    %25 = vector.load %arg5[%c0_14, %c0_15] : memref<2x64xf32, #tpu.memory_space<vmem>>, vector<1x64xf32>
    %26 = vector.broadcast %24 : vector<24x1xf32> to vector<24x64xf32>
    %27 = vector.broadcast %25 : vector<1x64xf32> to vector<24x64xf32>
    %28 = arith.mulf %26, %27 : vector<24x64xf32>
    %29 = arith.addf %23, %28 : vector<24x64xf32>
    %c0_16 = arith.constant 0 : index
    %c4 = arith.constant 4 : index
    %30 = vector.load %arg4[%c0_16, %c4] : memref<24x5xf32, #tpu.memory_space<vmem>>, vector<24x1xf32>
    %c1_17 = arith.constant 1 : index
    %c0_18 = arith.constant 0 : index
    %31 = vector.load %arg5[%c1_17, %c0_18] : memref<2x64xf32, #tpu.memory_space<vmem>>, vector<1x64xf32>
    %32 = vector.broadcast %30 : vector<24x1xf32> to vector<24x64xf32>
    %33 = vector.broadcast %31 : vector<1x64xf32> to vector<24x64xf32>
    %34 = arith.mulf %32, %33 : vector<24x64xf32>
    %35 = arith.addf %29, %34 : vector<24x64xf32>
    %c0_19 = arith.constant 0 : index
    %c0_20 = arith.constant 0 : index
    %c0_21 = arith.constant 0 : index
    %36 = vector.load %arg7[%c0_19, %c0_20, %c0_21] : memref<1x24x64xf32, #tpu.memory_space<vmem>>, vector<1x24x64xf32>
    %37 = vector.shape_cast %36 : vector<1x24x64xf32> to vector<24x64xf32>
    %38 = vector.shape_cast %35 : vector<24x64xf32> to vector<1x24x64xf32>
    tpu.vector_store %arg7[%c0_19, %c0_20, %c0_21], %38 {strides = array<i32>} : memref<1x24x64xf32, #tpu.memory_space<vmem>>, vector<1x24x64xf32>,
    return
  }
  func.func @transform_0(%arg0: i32, %arg1: i32) -> (i32, i32, i32) {
    %c0_i32 = arith.constant 0 : i32
    %c0_i32_0 = arith.constant 0 : i32
    return %arg0, %c0_i32, %arg1 : i32, i32, i32
  }
  func.func @transform_1(%arg0: i32, %arg1: i32) -> (i32, i32) {
    %c0_i32 = arith.constant 0 : i32
    %c0_i32_0 = arith.constant 0 : i32
    %c0_i32_1 = arith.constant 0 : i32
    return %c0_i32, %c0_i32_0 : i32, i32
  }
  func.func @transform_2(%arg0: i32, %arg1: i32) -> (i32, i32) {
    %c0_i32 = arith.constant 0 : i32
    %c0_i32_0 = arith.constant 0 : i32
    %c0_i32_1 = arith.constant 0 : i32
    return %c0_i32, %c0_i32_0 : i32, i32
  }
  func.func @transform_3(%arg0: i32, %arg1: i32) -> (i32, i32) {
    %c0_i32 = arith.constant 0 : i32
    %c0_i32_0 = arith.constant 0 : i32
    return %c0_i32, %arg1 : i32, i32
  }
  func.func @transform_4(%arg0: i32, %arg1: i32) -> (i32, i32, i32) {
    %c0_i32 = arith.constant 0 : i32
    %c0_i32_0 = arith.constant 0 : i32
    return %arg0, %c0_i32, %arg1 : i32, i32, i32
  }
  func.func @transform_5(%arg0: i32, %arg1: i32) -> (i32, i32, i32) {
    %c0_i32 = arith.constant 0 : i32
    %c0_i32_0 = arith.constant 0 : i32
    return %arg0, %c0_i32, %arg1 : i32, i32, i32
  }
}

</mosaic_0001>

<bundles_post_ra>
// kernel: tile.13
= control target key start
LH: loop header
LB: loop body
LE: loop exit
PB: predicated region body
PF: predicated region fallthrough
CT: control target
= control target key end

     0   :  { %s28_s0 = inlined_call_operand.vmem [shape: f32[16], index: 0, kind: input, shape index: {}]   ;;  %s29_s1 = inlined_call_operand.vmem [shape: f32[16,16], index: 1, kind: output, shape index: {}]  }
   0x1   :  { %v4_v0 = vld [vmem:[%s28_s0] ss:$0 sm:$0xff] }
   0x2   :  { %5 = vst [vmem:[%s29_s1] sm:$0xff] %v4_v0 }
   0x3   :  { %8 = vst [vmem:[%s29_s1 + $0x8] sm:$0xff] %v4_v0 }

// kernel: tile.18
= control target key start
LH: loop header
LB: loop body
LE: loop exit
PB: predicated region body
PF: predicated region fallthrough
CT: control target
= control target key end

     0   :  { %s22_s0 = inlined_call_operand.vmem [shape: f32[8], index: 0, kind: input, shape index: {}]   ;;  %s23_s1 = inlined_call_operand.vmem [shape: f32[8,8], index: 1, kind: output, shape index: {}]  }
   0x1   :  { %v4_v0 = vld [vmem:[%s22_s0] ss:$0 sm:$0xff] }
   0x2   :  { %5 = vst [vmem:[%s23_s1] sm:$0xff] %v4_v0 }

// kernel: detect_forward.2
= control target key start
LH: loop header
LB: loop body
LE: loop exit
PB: predicated region body
PF: predicated region fallthrough
CT: control target
= control target key end

     0   :  { %s930_s18 = smov 0   ;;  %s932_s19 = smov 0   ;;  %s1153_s0 = inlined_call_operand.vmem [shape: f32[2,8,256], index: 0, kind: input, shape index: {}]   ;;  %s1154_s1 = inlined_call_operand.vmem [shape: f32[24,8], index: 1, kind: input, shape index: {}]   ;;  %s1155_s2 = inlined_call_operand.vmem [shape: f32[24,5], index: 2, kind: input, shape index: {}]   ;;  %s1156_s3 = inlined_call_operand.vmem [shape: f32[2,256], index: 3, kind: input, shape index: {}]   ;;  %s1157_s4 = inlined_call_operand.vmem [shape: f32[2,24,256], index: 4, kind: output, shape index: {0}]   ;;  %s1158_s5 = inlined_call_operand.vmem [shape: f32[2,24,256], index: 5, kind: output, shape index: {1}]  }
   0x1   :  { %s934_s20 = smov 0  }
   0x2 LB: > { %s28_s21 = sadd.s32 1, %s889_s19  ;;  %p787_p0 = scmp.ge.s32.totalorder %s893_s20, 1  ;;  %s893_s20 = sphi %s934_s20, %s16_s20   ;;  %s889_s19 = sphi %s932_s19, %s1168_s19   ;;  %s885_s18 = sphi %s930_s18, %s1167_s18  }
   0x3   : > { %p30_p1 = scmp.ge.s32.totalorder %s28_s21, 2  ;;  %p224_p2 = scmp.lt.s32.totalorder %s893_s20, 3 }
   0x5   : > { %s1170_s21 = smov (%p30_p1, %s28_s21), 0  ;;  %p225_p3 = pnand %p787_p0, %p224_p2 }
   0x6   : > { %p275_p4 = scmp.lt.s32.totalorder (!%p225_p3), %s885_s18, 1 }
   0x7   : > { %228 = sbr.rel (%p225_p3) target bundleno = 206 (0xce), region = 36 }
   0xc   : > { %v895_v0 = vmov 0   ;;  %v315_v1 = vld [vmem:[%s1155_s2] sm:$0xff]  ;;  %v317_v2 = vld [vmem:[%s1155_s2 + $0x10] sm:$0xff]  ;;  %s1172_s18 = smov (!%p275_p4, %s885_s18), 1  ;;  %v316_v3 = vld [vmem:[%s1155_s2 + $0x8] sm:$0xff]  ;;  %v896_v4 = vmov 1  }
   0xd   : > { %834 = vset.pattern.permute.xlu0 %v895_v0  ;;  %835 = vset.pattern.permute.xlu1 %v895_v0  ;;  %s801_s28 = sshll.u32 %s1172_s18, 4  ;;  %v310_v5 = vld [vmem:[%s1154_s1] sm:$0xff]  ;;  %vm333_vm0 = vcmask 64512   ;;  %v311_v8 = vld [vmem:[%s1154_s1 + $0x8] sm:$0xff]  ;;  %v312_v9 = vld [vmem:[%s1154_s1 + $0x10] sm:$0xff]  ;;  %v897_v10 = vmov 2  }
   0xe   : > { %320 = vperm.xlu0 %834, %v315_v1   ;;  %330 = vperm.xlu1 %835, %v317_v2   ;;  %s282_s6 = scalar_lea.vmem %s1153_s0, %s801_s28  ;;  %v898_v11 = vmov 3   ;;  %v899_v12 = vmov 4   ;;  %s804_s13 = smul.u32 48, %s1172_s18  ;;  %v563_v44 = vld [vmem:[%s1156_s3] ss:$2 sm:$0x3] }
   0xf   : > { %837 = vset.pattern.permute.xlu2 %v896_v4  ;;  %v313_v6 = vld [vmem:[%s282_s6] sm:$0xff]  ;;  %v314_v7 = vld [vmem:[%s282_s6 + $0x8] sm:$0xff]  ;;  %v1013_v50 = vperm.slane %v563_v44, 0  ;;  %v1015_v51 = vperm.slane %v563_v44, 1 }
  0x10   : > { %519 = vperm.xlu2 %837, %v316_v3   ;;  %358 = vmatpush.msra.mxu0 %v313_v6  ;;  %s986_s16 = scalar_lea.vmem %s1157_s4, %s804_s13  ;;  %v798_v56 = vld [vmem:[%s1156_s3 + $0x1] ss:$2 sm:$0x3]  ;;  %s1122_s27 = scalar_lea.vmem %s1158_s5, %s804_s13 }
  0x11   : > { %802 = vmatpush.msra.mxu2 %v313_v6  ;;  %384 = vmatpush.msra.mxu1 %v314_v7 }
  0x12   : > { %803 = vmatpush.msra.mxu3 %v314_v7  ;;  %792 = vmatmul.msk.f32.vlgmr.msra.gmra.mxu0 %vm333_vm0, %v310_v5  ;;  %v1041_v7 = vperm.slane %v798_v56, 1 }
  0x13   : > { %793 = vmatmul.msk.f32.vlgmr.msra.gmra.mxu2 %vm333_vm0, %v311_v8  ;;  %795 = vmatmul.msk.f32.vlgmr.msra.gmra.mxu1 %vm333_vm0, %v310_v5 }
  0x14   : > { %796 = vmatmul.msk.f32.vlgmr.msra.gmra.mxu3 %vm333_vm0, %v311_v8 }
  0x16   : > { %325 = vperm.xlu0 %834, %v316_v3   ;;  %836 = vset.pattern.permute.xlu1 %v896_v4 }
  0x17   : > { %514 = vperm.xlu1 %836, %v315_v1  }
  0x18   : > { %524 = vperm.xlu2 %837, %v317_v2  }
  0x1b   : > { %794 = vmatmul.msk.f32.gmra.mxu2 %vm333_vm0, %v312_v9 }
  0x1c   : > { %797 = vmatmul.msk.f32.gmra.mxu3 %vm333_vm0, %v312_v9 }
  0x1e   : > { %838 = vset.pattern.permute.xlu0 %v897_v10 }
  0x1f   : > { %839 = vset.pattern.permute.xlu1 %v897_v10  ;;  %540 = vperm.xlu0 %838, %v315_v1  }
  0x20   : > { %544 = vperm.xlu1 %839, %v316_v3   ;;  %840 = vset.pattern.permute.xlu2 %v897_v10 }
  0x21   : > { %548 = vperm.xlu2 %840, %v317_v2  }
  0x27   : > { %843 = vset.pattern.permute.xlu0 %v898_v11 }
  0x28   : > { %841 = vset.pattern.permute.xlu1 %v898_v11  ;;  %573 = vperm.xlu0 %843, %v317_v2  }
  0x29   : > { %565 = vperm.xlu1 %841, %v315_v1   ;;  %842 = vset.pattern.permute.xlu2 %v898_v11 }
  0x2a   : > { %569 = vperm.xlu2 %842, %v316_v3  }
  0x30   : > { %846 = vset.pattern.permute.xlu0 %v899_v12 }
  0x31   : > { %844 = vset.pattern.permute.xlu1 %v899_v12 }
  0x32   : > { %596 = vperm.xlu1 %844, %v315_v1   ;;  %845 = vset.pattern.permute.xlu2 %v899_v12 }
  0x33   : > { %600 = vperm.xlu2 %845, %v316_v3   ;;  %v1039_v3 = vperm.slane %v798_v56, 0 }
  0x3a   : > { %604 = vperm.xlu1 %844, %v317_v2  }
  0x6a   : > { %v979_v15 = vpop.permute.xlu2 %519 }
  0x72   : > { %v992_v30 = vpop.permute.xlu2 %524 }
  0x7b   : > { %v1003_v43 = vpop.permute.xlu2 %548 }
  0x80   : > { %v331_v13 = vpop.permute.xlu1 %330  ;;  %v321_v14 = vpop.permute.xlu0 %320 }
  0x84   : > { %v570_v6 = vpop.permute.xlu2 %569 }
  0x88   : > { %v326_v23 = vpop.permute.xlu0 %325 }
  0x89   : > { %v989_v21 = vpop.permute.xlu1 %514 }
  0x8f   : > { %v360_v16 = vpop.f32.mrf.mxu0 }
  0x90   : > { %v361_v17 = vadd.f32 %v360_v16, %v321_v14  ;;  %v386_v18 = vpop.f32.mrf.mxu1 }
  0x91   : > { %v387_v19 = vadd.f32 %v386_v18, %v321_v14 }
  0x92   : > { %395 = vst [vmem:[%s986_s16] sm:$0xff] %v361_v17  ;;  %v401_v20 = vsub.f32 0.0, %v361_v17  ;;  %v996_v36 = vpop.permute.xlu1 %544 }
  0x93   : > { %396 = vst [vmem:[%s986_s16 + $0x8] sm:$0xff] %v387_v19  ;;  %v402_v22 = vsub.f32 0.0, %v387_v19 }
  0x94   : > { %v407_v24 = vmul.f32 1.442695, %v401_v20 }
  0x95   : > { %v409_v25 = vmul.f32 1.442695, %v402_v22  ;;  %v1058_v22 = vmul.f32 %v1013_v50, %v570_v6 }
  0x96   : > { %v363_v26 = vpop.f32.mrf.mxu2  ;;  %847 = vpow2.f32 %v407_v24 }
  0x97   : > { %v364_v27 = vadd.f32 %v363_v26, %v326_v23  ;;  %v389_v28 = vpop.f32.mrf.mxu3  ;;  %849 = vpow2.f32 %v409_v25 }
  0x98   : > { %v390_v29 = vadd.f32 %v389_v28, %v326_v23 }
  0x99   : > { %397 = vst [vmem:[%s986_s16 + $0x10] sm:$0xff] %v364_v27  ;;  %v403_v31 = vsub.f32 0.0, %v364_v27 }
  0x9a   : > { %398 = vst [vmem:[%s986_s16 + $0x18] sm:$0xff] %v390_v29  ;;  %v404_v32 = vsub.f32 0.0, %v390_v29 }
  0x9b   : > { %v411_v33 = vmul.f32 1.442695, %v403_v31  ;;  %v566_v59 = vpop.permute.xlu1 %565 }
  0x9c   : > { %v413_v34 = vmul.f32 1.442695, %v404_v32  ;;  %v848_v35 = vpop.eup %847  ;;  %v1030_v62 = vmul.f32 %v1013_v50, %v566_v59  ;;  %v1033_v63 = vmul.f32 %v1015_v51, %v566_v59 }
  0x9d   : > { %851 = vpow2.f32 %v411_v33  ;;  %v850_v37 = vpop.eup %849  ;;  %v998_v38 = vadd.f32 1.0, %v848_v35 }
  0x9e   : > { %853 = vpow2.f32 %v413_v34  ;;  %v366_v39 = vpop.f32.mrf.mxu2  ;;  %v1000_v40 = vadd.f32 1.0, %v850_v37 }
  0x9f   : > { %v367_v41 = vadd.f32 %v366_v39, %v331_v13  ;;  %v392_v42 = vpop.f32.mrf.mxu3  ;;  %855 = vrcp.f32 %v998_v38  ;;  %v434_v58 = vand.u32 2147483647, %v998_v38  ;;  %v436_v61 = vand.u32 2147483648, %v998_v38 }
  0xa0   : > { %857 = vrcp.f32 %v1000_v40  ;;  %v393_v46 = vadd.f32 %v392_v42, %v331_v13  ;;  %v448_v1 = vand.u32 2147483647, %v1000_v40  ;;  %v450_v2 = vand.u32 2147483648, %v1000_v40 }
  0xa1   : > { %399 = vst [vmem:[%s986_s16 + $0x20] sm:$0xff] %v367_v41  ;;  %v405_v45 = vsub.f32 0.0, %v367_v41  ;;  %vm430_vm1 = vweird.f32 %v998_v38  ;;  %vm1044_vm2 = vcmp.eq.f32.partialorder %v434_v58, 8.507059e+37  ;;  %vm444_vm3 = vweird.f32 %v1000_v40 }
  0xa2   : > { %400 = vst [vmem:[%s986_s16 + $0x28] sm:$0xff] %v393_v46  ;;  %v406_v55 = vsub.f32 0.0, %v393_v46  ;;  %v437_v12 = vor.u32 1.1754944e-38, %v436_v61  ;;  %vm1051_vm5 = vcmp.eq.f32.partialorder %v448_v1, 8.507059e+37  ;;  %v451_v18 = vor.u32 1.1754944e-38, %v450_v2 }
  0xa3   : > { %v852_v47 = vpop.eup %851  ;;  %v415_v54 = vmul.f32 1.442695, %v405_v45 }
  0xa4   : > { %v854_v48 = vpop.eup %853  ;;  %v1010_v49 = vadd.f32 1.0, %v852_v47  ;;  %v417_v5 = vmul.f32 1.442695, %v406_v55  ;;  %v597_v58 = vpop.permute.xlu1 %596 }
  0xa5   : > { %v1017_v52 = vadd.f32 1.0, %v854_v48  ;;  %v856_v53 = vpop.eup %855  ;;  %v601_v48 = vpop.permute.xlu2 %600  ;;  %v613_v61 = vmul.f32 %v1041_v7, %v597_v58 }
  0xa6   : > { %859 = vrcp.f32 %v1010_v49  ;;  %v1023_v57 = vpop.eup %857  ;;  %v426_v60 = vmul.f32 %v856_v53, %v998_v38  ;;  %vm431_vm4 = vweird.f32 %v856_v53  ;;  %vm458_vm7 = vweird.f32 %v1010_v49 }
  0xa7   : > { %861 = vrcp.f32 %v1017_v52  ;;  %v440_v0 = vmul.f32 %v1023_v57, %v1000_v40  ;;  %vm445_vm6 = vweird.f32 %v1023_v57  ;;  %v462_v24 = vand.u32 2147483647, %v1010_v49  ;;  %vm1065_vm8 = vmor %vm430_vm1, %vm431_vm4 }
  0xa8   : > { %v427_v4 = vsub.f32 1.0, %v426_v60  ;;  %863 = vpow2.f32 %v415_v54  ;;  %v464_v28 = vand.u32 2147483648, %v1010_v49  ;;  %v478_v31 = vand.u32 2147483648, %v1017_v52  ;;  %vm1079_vm10 = vmor %vm444_vm3, %vm445_vm6 }
  0xa9   : > { %v441_v9 = vsub.f32 1.0, %v440_v0  ;;  %865 = vpow2.f32 %v417_v5  ;;  %v476_v34 = vand.u32 2147483647, %v1017_v52  ;;  %vm472_vm12 = vweird.f32 %v1017_v52 }
  0xaa   : > { %v428_v11 = vmul.f32 %v856_v53, %v427_v4  ;;  %vm463_vm14 = vcmp.eq.f32.partialorder %v462_v24, 8.507059e+37  ;;  %v465_v45 = vor.u32 1.1754944e-38, %v464_v28  ;;  %v479_v47 = vor.u32 1.1754944e-38, %v478_v31 }
  0xab   : > { %v442_v16 = vmul.f32 %v1023_v57, %v441_v9  ;;  %vm477_vm0 = vcmp.eq.f32.partialorder %v476_v34, 8.507059e+37  ;;  %v612_v60 = vmul.f32 %v1039_v3, %v597_v58  ;;  %v614_v0 = vmul.f32 %v1039_v3, %v601_v48 }
  0xac   : > { %v860_v10 = vpop.eup %859  ;;  %v429_v20 = vadd.f32 %v856_v53, %v428_v11  ;;  %v615_v5 = vmul.f32 %v1041_v7, %v601_v48 }
  0xad   : > { %v862_v13 = vpop.eup %861  ;;  %v454_v14 = vmul.f32 %v860_v10, %v1010_v49  ;;  %v443_v26 = vadd.f32 %v1023_v57, %v442_v16  ;;  %vm459_vm9 = vweird.f32 %v860_v10  ;;  %v584_v49 = vmul.f32 %v1015_v51, %v570_v6 }
  0xae   : > { %v468_v19 = vmul.f32 %v862_v13, %v1017_v52  ;;  %v864_v27 = vpop.eup %863  ;;  %v433_v32 = vsel %vm1065_vm8, %v856_v53, %v429_v20  ;;  %vm473_vm11 = vweird.f32 %v862_v13  ;;  %vm460_vm13 = vmor %vm458_vm7, %vm459_vm9 }
  0xaf   : > { %v455_v23 = vsub.f32 1.0, %v454_v14  ;;  %v1083_v37 = vadd.f32 1.0, %v864_v27  ;;  %v866_v38 = vpop.eup %865  ;;  %v438_v41 = vsel %vm1044_vm2, %v437_v12, %v433_v32  ;;  %v447_v42 = vsel %vm1079_vm10, %v1023_v57, %v443_v26  ;;  %vm474_vm15 = vmor %vm472_vm12, %vm473_vm11  ;;  %v541_v57 = vpop.permute.xlu0 %540 }
  0xb0   : > { %v469_v29 = vsub.f32 1.0, %v468_v19  ;;  %v1092_v40 = vadd.f32 1.0, %v866_v38  ;;  %v452_v54 = vsel %vm1051_vm5, %v451_v18, %v447_v42  ;;  %v533_v52 = vmul.f32 %v438_v41, %v438_v41 }
  0xb1   : > { %v456_v33 = vmul.f32 %v860_v10, %v455_v23  ;;  %867 = vrcp.f32 %v1083_v37  ;;  %v534_v4 = vmul.f32 %v452_v54, %v452_v54  ;;  %v527_v9 = vmul.f32 %v989_v21, %v438_v41 }
  0xb2   : > { %v470_v39 = vmul.f32 %v862_v13, %v469_v29  ;;  %869 = vrcp.f32 %v1092_v40  ;;  %vm486_vm1 = vweird.f32 %v1083_v37  ;;  %v551_v6 = vmul.f32 %v541_v57, %v533_v52 }
  0xb3   : > { %v457_v44 = vadd.f32 %v860_v10, %v456_v33  ;;  %v490_v18 = vand.u32 2147483647, %v1083_v37  ;;  %v552_v19 = vmul.f32 %v541_v57, %v534_v4  ;;  %v492_v23 = vand.u32 2147483648, %v1083_v37 }
  0xb4   : > { %v471_v46 = vadd.f32 %v862_v13, %v470_v39  ;;  %v557_v20 = vadd.f32 %v551_v6, %v527_v9  ;;  %v504_v26 = vand.u32 2147483647, %v1092_v40  ;;  %v506_v32 = vand.u32 2147483648, %v1092_v40 }
  0xb5   : > { %v461_v53 = vsel %vm460_vm13, %v860_v10, %v457_v44  ;;  %v528_v10 = vmul.f32 %v989_v21, %v452_v54  ;;  %v493_v41 = vor.u32 1.1754944e-38, %v492_v23  ;;  %vm491_vm5 = vcmp.eq.f32.partialorder %v490_v18, 8.507059e+37 }
  0xb6   : > { %v466_v55 = vsel %vm463_vm14, %v465_v45, %v461_v53  ;;  %v475_v56 = vsel %vm474_vm15, %v862_v13, %v471_v46  ;;  %v587_v29 = vadd.f32 %v1030_v62, %v557_v20  ;;  %vm500_vm6 = vweird.f32 %v1092_v40 }
  0xb7   : > { %v480_v59 = vsel %vm477_vm0, %v479_v47, %v475_v56  ;;  %v535_v1 = vmul.f32 %v466_v55, %v466_v55  ;;  %v868_v8 = vpop.eup %867  ;;  %v529_v11 = vmul.f32 %v979_v15, %v466_v55  ;;  %v558_v28 = vadd.f32 %v552_v19, %v528_v10  ;;  %v574_v47 = vpop.permute.xlu0 %573 }
  0xb8   : > { %v536_v2 = vmul.f32 %v480_v59, %v480_v59  ;;  %v482_v12 = vmul.f32 %v868_v8, %v1083_v37  ;;  %v870_v16 = vpop.eup %869  ;;  %v530_v17 = vmul.f32 %v979_v15, %v480_v59  ;;  %vm487_vm2 = vweird.f32 %v868_v8  ;;  %v605_v56 = vpop.permute.xlu1 %604 }
  0xb9   : > { %v553_v13 = vmul.f32 %v996_v36, %v535_v1  ;;  %v496_v24 = vmul.f32 %v870_v16, %v1092_v40  ;;  %v588_v34 = vadd.f32 %v1033_v63, %v558_v28  ;;  %v618_v35 = vadd.f32 %v612_v60, %v587_v29  ;;  %vm488_vm4 = vmor %vm486_vm1, %vm487_vm2 }
  0xba   : > { %v554_v14 = vmul.f32 %v996_v36, %v536_v2  ;;  %v483_v21 = vsub.f32 1.0, %v482_v12  ;;  %vm501_vm3 = vweird.f32 %v870_v16  ;;  %v507_v46 = vor.u32 1.1754944e-38, %v506_v32 }
  0xbb   : > { %v559_v25 = vadd.f32 %v553_v13, %v529_v11  ;;  %v497_v36 = vsub.f32 1.0, %v496_v24  ;;  %v619_v42 = vadd.f32 %v613_v61, %v588_v34  ;;  %624 = vst [vmem:[%s1122_s27] sm:$0xff] %v618_v35  ;;  %vm502_vm7 = vmor %vm500_vm6, %vm501_vm3  ;;  %vm505_vm8 = vcmp.eq.f32.partialorder %v504_v26, 8.507059e+37 }
  0xbc   : > { %v560_v27 = vadd.f32 %v554_v14, %v530_v17  ;;  %v484_v15 = vmul.f32 %v868_v8, %v483_v21  ;;  %v585_v40 = vmul.f32 %v1013_v50, %v574_v47  ;;  %v586_v59 = vmul.f32 %v1015_v51, %v574_v47 }
  0xbd   : > { %v589_v31 = vadd.f32 %v1058_v22, %v559_v25  ;;  %v498_v38 = vmul.f32 %v870_v16, %v497_v36  ;;  %625 = vst [vmem:[%s1122_s27 + $0x8] sm:$0xff] %v619_v42  ;;  %v616_v61 = vmul.f32 %v1039_v3, %v605_v56  ;;  %v617_v1 = vmul.f32 %v1041_v7, %v605_v56 }
  0xbe   : > { %v590_v33 = vadd.f32 %v584_v49, %v560_v27  ;;  %v485_v62 = vadd.f32 %v868_v8, %v484_v15 }
  0xbf   : > { %v620_v39 = vadd.f32 %v614_v0, %v589_v31  ;;  %v499_v45 = vadd.f32 %v870_v16, %v498_v38 }
  0xc0   : > { %v621_v22 = vadd.f32 %v615_v5, %v590_v33  ;;  %v489_v44 = vsel %vm488_vm4, %v868_v8, %v485_v62 }
  0xc1   : > { %626 = vst [vmem:[%s1122_s27 + $0x10] sm:$0xff] %v620_v39  ;;  %v494_v63 = vsel %vm491_vm5, %v493_v41, %v489_v44  ;;  %v503_v48 = vsel %vm502_vm7, %v870_v16, %v499_v45 }
  0xc2   : > { %v537_v37 = vmul.f32 %v494_v63, %v494_v63  ;;  %627 = vst [vmem:[%s1122_s27 + $0x18] sm:$0xff] %v621_v22  ;;  %v508_v53 = vsel %vm505_vm8, %v507_v46, %v503_v48  ;;  %v531_v54 = vmul.f32 %v992_v30, %v494_v63 }
  0xc3   : > { %v538_v52 = vmul.f32 %v508_v53, %v508_v53  ;;  %v532_v57 = vmul.f32 %v992_v30, %v508_v53 }
  0xc4   : > { %v555_v55 = vmul.f32 %v1003_v43, %v537_v37 }
  0xc5   : > { %v556_v49 = vmul.f32 %v1003_v43, %v538_v52 }
  0xc6   : > { %v561_v58 = vadd.f32 %v555_v55, %v531_v54 }
  0xc7   : > { %v562_v60 = vadd.f32 %v556_v49, %v532_v57 }
  0xc8   : > { %v591_v0 = vadd.f32 %v585_v40, %v561_v58 }
  0xc9   : > { %v592_v2 = vadd.f32 %v586_v59, %v562_v60 }
  0xca   : > { %v622_v4 = vadd.f32 %v616_v61, %v591_v0 }
  0xcb   : > { %v623_v5 = vadd.f32 %v617_v1, %v592_v2 }
  0xcc   : > { %628 = vst [vmem:[%s1122_s27 + $0x20] sm:$0xff] %v622_v4 }
  0xcd   : > { %629 = vst [vmem:[%s1122_s27 + $0x28] sm:$0xff] %v623_v5 }
  0xce PF: > { %s16_s20 = sadd.s32 1, %s893_s20   ;;  %s1167_s18 = smov %s889_s19 }
  0xcf   : > { %p13_p5 = scmp.ge.s32.totalorder %s16_s20, 4   ;;  %s1168_s19 = smov %s1170_s21 }
  0xd1   :  { %15 = sbr.rel (!%p13_p5) target bundleno = 2 (0x2), region = 82 }

// kernel: detect_forward.3
= control target key start
LH: loop header
LB: loop body
LE: loop exit
PB: predicated region body
PF: predicated region fallthrough
CT: control target
= control target key end

     0   :  { %s778_s18 = smov 0   ;;  %s780_s19 = smov 0   ;;  %s864_s0 = inlined_call_operand.vmem [shape: f32[2,16,64], index: 0, kind: input, shape index: {}]   ;;  %s865_s1 = inlined_call_operand.vmem [shape: f32[24,16], index: 1, kind: input, shape index: {}]   ;;  %s866_s2 = inlined_call_operand.vmem [shape: f32[24,5], index: 2, kind: input, shape index: {}]   ;;  %s867_s3 = inlined_call_operand.vmem [shape: f32[2,64], index: 3, kind: input, shape index: {}]   ;;  %s868_s4 = inlined_call_operand.vmem [shape: f32[2,24,64], index: 4, kind: output, shape index: {0}]   ;;  %s869_s5 = inlined_call_operand.vmem [shape: f32[2,24,64], index: 5, kind: output, shape index: {1}]  }
   0x1   :  { %s782_s20 = smov 0  }
   0x2 LB: > { %s28_s21 = sadd.s32 1, %s737_s19  ;;  %p647_p0 = scmp.ge.s32.totalorder %s741_s20, 1  ;;  %s741_s20 = sphi %s782_s20, %s16_s20   ;;  %s737_s19 = sphi %s780_s19, %s871_s19   ;;  %s733_s18 = sphi %s778_s18, %s870_s18  }
   0x3   : > { %p30_p1 = scmp.ge.s32.totalorder %s28_s21, 2  ;;  %p220_p2 = scmp.lt.s32.totalorder %s741_s20, 3 }
   0x5   : > { %s873_s21 = smov (%p30_p1, %s28_s21), 0  ;;  %p221_p3 = pnand %p647_p0, %p220_p2 }
   0x6   : > { %p266_p4 = scmp.lt.s32.totalorder (!%p221_p3), %s733_s18, 1 }
   0x7   : > { %224 = sbr.rel (%p221_p3) target bundleno = 196 (0xc4), region = 36 }
   0xc   : > { %v743_v0 = vmov 0   ;;  %v299_v1 = vld [vmem:[%s866_s2] sm:$0xff]  ;;  %v301_v2 = vld [vmem:[%s866_s2 + $0x10] sm:$0xff]  ;;  %s875_s18 = smov (!%p266_p4, %s733_s18), 1  ;;  %v300_v3 = vld [vmem:[%s866_s2 + $0x8] sm:$0xff]  ;;  %v744_v4 = vmov 1  }
   0xd   : > { %692 = vset.pattern.permute.xlu0 %v743_v0  ;;  %693 = vset.pattern.permute.xlu1 %v743_v0  ;;  %s657_s28 = sshll.u32 %s875_s18, 4  ;;  %v294_v7 = vld [vmem:[%s865_s1] sm:$0xff]  ;;  %vm317_vm0 = vcmask 130048   ;;  %v295_v8 = vld [vmem:[%s865_s1 + $0x8] sm:$0xff]  ;;  %v296_v9 = vld [vmem:[%s865_s1 + $0x10] sm:$0xff]  ;;  %v745_v10 = vmov 2  }
   0xe   : > { %304 = vperm.xlu0 %692, %v299_v1   ;;  %314 = vperm.xlu1 %693, %v301_v2   ;;  %s273_s6 = scalar_lea.vmem %s864_s0, %s657_s28  ;;  %v746_v11 = vmov 3   ;;  %v747_v12 = vmov 4   ;;  %s662_s13 = smul.u32 24, %s875_s18  ;;  %vm353_vm1 = vcmask 523264  }
   0xf   : > { %695 = vset.pattern.permute.xlu2 %v744_v4  ;;  %v298_v5 = vld [vmem:[%s273_s6 + $0x8] sm:$0xff]  ;;  %v297_v6 = vld [vmem:[%s273_s6] sm:$0xff] }
  0x10   : > { %421 = vperm.xlu2 %695, %v300_v3   ;;  %341 = vmatpush.msra.mxu0 %v298_v5  ;;  %s285_s16 = scalar_lea.vmem %s868_s4, %s662_s13  ;;  %s293_s27 = scalar_lea.vmem %s869_s5, %s662_s13 }
  0x11   : > { %658 = vmatpush.msra.mxu1 %v298_v5  ;;  %659 = vmatpush.msra.mxu2 %v298_v5 }
  0x12   : > { %342 = vmatpush.msra.mxu0 %v297_v6 }
  0x13   : > { %660 = vmatpush.msra.mxu1 %v297_v6  ;;  %661 = vmatpush.msra.mxu2 %v297_v6 }
  0x14   : > { %652 = vmatmul.msk.f32.vlgmr.msra.gmra.mxu0 %vm317_vm0, %v294_v7  ;;  %653 = vmatmul.msk.f32.vlgmr.msra.gmra.mxu1 %vm317_vm0, %v295_v8 }
  0x15   : > { %654 = vmatmul.msk.f32.vlgmr.msra.gmra.mxu2 %vm317_vm0, %v296_v9  ;;  %v706_v9 = vld [vmem:[%s867_s3 + $0x1] ss:$0 sm:$0xff] }
  0x16   : > { %309 = vperm.xlu0 %692, %v300_v3   ;;  %694 = vset.pattern.permute.xlu1 %v744_v4 }
  0x17   : > { %416 = vperm.xlu1 %694, %v299_v1  }
  0x18   : > { %426 = vperm.xlu2 %695, %v301_v2  }
  0x1e   : > { %696 = vset.pattern.permute.xlu0 %v745_v10 }
  0x1f   : > { %697 = vset.pattern.permute.xlu1 %v745_v10  ;;  %436 = vperm.xlu0 %696, %v299_v1  }
  0x20   : > { %440 = vperm.xlu1 %697, %v300_v3   ;;  %698 = vset.pattern.permute.xlu2 %v745_v10 }
  0x21   : > { %444 = vperm.xlu2 %698, %v301_v2  }
  0x27   : > { %701 = vset.pattern.permute.xlu0 %v746_v11 }
  0x28   : > { %699 = vset.pattern.permute.xlu1 %v746_v11  ;;  %463 = vperm.xlu0 %701, %v301_v2  }
  0x29   : > { %455 = vperm.xlu1 %699, %v299_v1   ;;  %700 = vset.pattern.permute.xlu2 %v746_v11 }
  0x2a   : > { %459 = vperm.xlu2 %700, %v300_v3  }
  0x30   : > { %704 = vset.pattern.permute.xlu0 %v747_v12 }
  0x31   : > { %702 = vset.pattern.permute.xlu1 %v747_v12 }
  0x32   : > { %475 = vperm.xlu1 %702, %v299_v1   ;;  %703 = vset.pattern.permute.xlu2 %v747_v12 }
  0x33   : > { %479 = vperm.xlu2 %703, %v300_v3  }
  0x3a   : > { %483 = vperm.xlu1 %702, %v301_v2   ;;  %v705_v2 = vld [vmem:[%s867_s3] ss:$0 sm:$0xff] }
  0x6a   : > { %v821_v15 = vpop.permute.xlu2 %421 }
  0x72   : > { %v832_v27 = vpop.permute.xlu2 %426 }
  0x7b   : > { %v835_v36 = vpop.permute.xlu2 %444 }
  0x80   : > { %v305_v13 = vpop.permute.xlu0 %304  ;;  %v315_v14 = vpop.permute.xlu1 %314 }
  0x84   : > { %v460_v45 = vpop.permute.xlu2 %459 }
  0x85   : > { %v468_v10 = vmul.f32 %v705_v2, %v460_v45 }
  0x88   : > { %v310_v17 = vpop.permute.xlu0 %309 }
  0x89   : > { %v829_v22 = vpop.permute.xlu1 %416 }
  0x8d   : > { %v480_v12 = vpop.permute.xlu2 %479 }
  0x91   : > { %v344_v16 = vpop.f32.mrf.mxu0  ;;  %v347_v19 = vpop.f32.mrf.mxu1 }
  0x92   : > { %v345_v18 = vadd.f32 %v344_v16, %v305_v13  ;;  %v348_v20 = vadd.f32 %v347_v19, %v310_v17  ;;  %v441_v32 = vpop.permute.xlu1 %440  ;;  %v437_v55 = vpop.permute.xlu0 %436 }
  0x94   : > { %354 = vst.msk [vmem:[%s285_s16] sm:$0xff] %vm353_vm1, %v345_v18  ;;  %v357_v21 = vsub.f32 0.0, %v345_v18  ;;  %v358_v23 = vsub.f32 0.0, %v348_v20 }
  0x95   : > { %355 = vst.msk [vmem:[%s285_s16 + $0x8] sm:$0xff] %vm353_vm1, %v348_v20 }
  0x96   : > { %v360_v24 = vmul.f32 1.442695, %v357_v21  ;;  %v362_v25 = vmul.f32 1.442695, %v358_v23 }
  0x98   : > { %707 = vpow2.f32 %v360_v24  ;;  %v350_v26 = vpop.f32.mrf.mxu2 }
  0x99   : > { %709 = vpow2.f32 %v362_v25  ;;  %v351_v28 = vadd.f32 %v350_v26, %v315_v14 }
  0x9a   : > { %v464_v26 = vpop.permute.xlu0 %463 }
  0x9b   : > { %356 = vst.msk [vmem:[%s285_s16 + $0x10] sm:$0xff] %vm353_vm1, %v351_v28  ;;  %v359_v29 = vsub.f32 0.0, %v351_v28  ;;  %v456_v42 = vpop.permute.xlu1 %455 }
  0x9c   : > { %v467_v18 = vmul.f32 %v705_v2, %v456_v42 }
  0x9d   : > { %v364_v30 = vmul.f32 1.442695, %v359_v29 }
  0x9e   : > { %v708_v31 = vpop.eup %707 }
  0x9f   : > { %v710_v33 = vpop.eup %709  ;;  %v366_v34 = vadd.f32 1.0, %v708_v31  ;;  %711 = vpow2.f32 %v364_v30 }
  0xa0   : > { %v367_v35 = vadd.f32 1.0, %v710_v33  ;;  %v469_v33 = vmul.f32 %v705_v2, %v464_v26 }
  0xa1   : > { %713 = vrcp.f32 %v366_v34  ;;  %v380_v47 = vand.u32 2147483648, %v366_v34  ;;  %v378_v50 = vand.u32 2147483647, %v366_v34  ;;  %vm374_vm4 = vweird.f32 %v366_v34 }
  0xa2   : > { %715 = vrcp.f32 %v367_v35  ;;  %v394_v48 = vand.u32 2147483648, %v367_v35  ;;  %v392_v52 = vand.u32 2147483647, %v367_v35  ;;  %vm388_vm5 = vweird.f32 %v367_v35 }
  0xa3   : > { %v381_v57 = vor.u32 1.1754944e-38, %v380_v47  ;;  %vm379_vm8 = vcmp.eq.f32.partialorder %v378_v50, 8.507059e+37 }
  0xa4   : > { %v395_v59 = vor.u32 1.1754944e-38, %v394_v48  ;;  %vm393_vm9 = vcmp.eq.f32.partialorder %v392_v52, 8.507059e+37  ;;  %v476_v3 = vpop.permute.xlu1 %475 }
  0xa5   : > { %v712_v37 = vpop.eup %711  ;;  %v487_v24 = vmul.f32 %v706_v9, %v476_v3 }
  0xa6   : > { %v368_v38 = vadd.f32 1.0, %v712_v37 }
  0xa7   : > { %v714_v39 = vpop.eup %713 }
  0xa8   : > { %v716_v40 = vpop.eup %715  ;;  %v370_v41 = vmul.f32 %v714_v39, %v366_v34  ;;  %717 = vrcp.f32 %v368_v38  ;;  %vm375_vm2 = vweird.f32 %v714_v39  ;;  %v408_v1 = vand.u32 2147483648, %v368_v38 }
  0xa9   : > { %v384_v43 = vmul.f32 %v716_v40, %v367_v35  ;;  %vm389_vm3 = vweird.f32 %v716_v40  ;;  %vm376_vm6 = vmor %vm374_vm4, %vm375_vm2  ;;  %v406_v6 = vand.u32 2147483647, %v368_v38  ;;  %vm402_vm11 = vweird.f32 %v368_v38 }
  0xaa   : > { %v371_v44 = vsub.f32 1.0, %v370_v41  ;;  %vm390_vm7 = vmor %vm388_vm5, %vm389_vm3  ;;  %v409_v17 = vor.u32 1.1754944e-38, %v408_v1 }
  0xab   : > { %v385_v46 = vsub.f32 1.0, %v384_v43  ;;  %vm407_vm13 = vcmp.eq.f32.partialorder %v406_v6, 8.507059e+37 }
  0xac   : > { %v372_v49 = vmul.f32 %v714_v39, %v371_v44  ;;  %v484_v34 = vpop.permute.xlu1 %483 }
  0xad   : > { %v386_v51 = vmul.f32 %v716_v40, %v385_v46  ;;  %v489_v37 = vmul.f32 %v706_v9, %v484_v34 }
  0xae   : > { %v718_v53 = vpop.eup %717  ;;  %v373_v54 = vadd.f32 %v714_v39, %v372_v49 }
  0xaf   : > { %v387_v56 = vadd.f32 %v716_v40, %v386_v51  ;;  %v398_v58 = vmul.f32 %v718_v53, %v368_v38  ;;  %vm403_vm10 = vweird.f32 %v718_v53 }
  0xb0   : > { %v377_v60 = vsel %vm376_vm6, %v714_v39, %v373_v54  ;;  %vm404_vm12 = vmor %vm402_vm11, %vm403_vm10 }
  0xb1   : > { %v391_v61 = vsel %vm390_vm7, %v716_v40, %v387_v56  ;;  %v382_v62 = vsel %vm379_vm8, %v381_v57, %v377_v60  ;;  %v399_v63 = vsub.f32 1.0, %v398_v58 }
  0xb2   : > { %v396_v0 = vsel %vm393_vm9, %v395_v59, %v391_v61  ;;  %v432_v4 = vmul.f32 %v382_v62, %v382_v62  ;;  %v429_v8 = vmul.f32 %v829_v22, %v382_v62  ;;  %v488_v22 = vmul.f32 %v706_v9, %v480_v12 }
  0xb3   : > { %v400_v5 = vmul.f32 %v718_v53, %v399_v63  ;;  %v433_v7 = vmul.f32 %v396_v0, %v396_v0  ;;  %v430_v13 = vmul.f32 %v821_v15, %v396_v0 }
  0xb4   : > { %v447_v11 = vmul.f32 %v437_v55, %v432_v4 }
  0xb5   : > { %v401_v14 = vadd.f32 %v718_v53, %v400_v5  ;;  %v448_v16 = vmul.f32 %v441_v32, %v433_v7 }
  0xb6   : > { %v450_v19 = vadd.f32 %v447_v11, %v429_v8 }
  0xb7   : > { %v405_v20 = vsel %vm404_vm12, %v718_v53, %v401_v14  ;;  %v451_v21 = vadd.f32 %v448_v16, %v430_v13 }
  0xb8   : > { %v410_v23 = vsel %vm407_vm13, %v409_v17, %v405_v20  ;;  %v470_v25 = vadd.f32 %v467_v18, %v450_v19 }
  0xb9   : > { %v434_v15 = vmul.f32 %v410_v23, %v410_v23  ;;  %v471_v28 = vadd.f32 %v468_v10, %v451_v21  ;;  %v431_v30 = vmul.f32 %v832_v27, %v410_v23 }
  0xba   : > { %v490_v29 = vadd.f32 %v487_v24, %v470_v25 }
  0xbb   : > { %v449_v31 = vmul.f32 %v835_v36, %v434_v15  ;;  %v491_v32 = vadd.f32 %v488_v22, %v471_v28 }
  0xbc   : > { %493 = vst.msk [vmem:[%s293_s27] sm:$0xff] %vm353_vm1, %v490_v29 }
  0xbd   : > { %v452_v35 = vadd.f32 %v449_v31, %v431_v30  ;;  %494 = vst.msk [vmem:[%s293_s27 + $0x8] sm:$0xff] %vm353_vm1, %v491_v32 }
  0xbf   : > { %v472_v38 = vadd.f32 %v469_v33, %v452_v35 }
  0xc1   : > { %v492_v39 = vadd.f32 %v489_v37, %v472_v38 }
  0xc3   : > { %495 = vst.msk [vmem:[%s293_s27 + $0x10] sm:$0xff] %vm353_vm1, %v492_v39 }
  0xc4 PF: > { %s16_s20 = sadd.s32 1, %s741_s20   ;;  %s870_s18 = smov %s737_s19 }
  0xc5   : > { %p13_p5 = scmp.ge.s32.totalorder %s16_s20, 4   ;;  %s871_s19 = smov %s873_s21 }
  0xc7   :  { %15 = sbr.rel (!%p13_p5) target bundleno = 2 (0x2), region = 81 }

</bundles_post_ra>
